<compile_context>
chip_gen: v7x
topology: tpu7x:2x2x1
jax: 0.10.0
libtpu: 0.0.40
codegen_flags: <defaults>
</compile_context>

<pallas_src>
import functools

import jax
import jax.numpy as jnp
from jax.experimental import pallas as pl
from jax.experimental.pallas import tpu as pltpu

_LANE = 128
_SUBLANE = 8


# -----------------------------------------------------------------------------
# Pallas kernel: per-(split, sample) partial sum-of-squares of (grad + eps)
# -----------------------------------------------------------------------------
def _gp_partial_kernel(g_ref, o_ref, acc_ref, *, eps, num_s, num_blocks, rem_rows):
    """g_ref:  (1, S, 128) block of the [B, R, 128] gradient view.
       o_ref:  (1, 1, 8, 128) per-(split, b) lane-wise partial sums.
       acc_ref: (8, 128) f32 VMEM accumulator, resident across the s axis."""
    split = pl.program_id(0)
    s = pl.program_id(2)

    @pl.when(s == 0)
    def _():
        acc_ref[...] = jnp.zeros_like(acc_ref)

    def accumulate(g):
        # +eps elementwise before squaring matches torch: (grad + eps).norm(2, dim=1)
        g = g.astype(jnp.float32) + eps                     # (1, S, 128)
        s_blk = g.shape[1]
        g2 = (g * g).reshape(s_blk // _SUBLANE, _SUBLANE, _LANE)
        acc_ref[...] += jnp.sum(g2, axis=0)                 # pure vreg adds (no XLU)

    if rem_rows == 0:
        accumulate(g_ref[...])
    else:
        # Only the last global R-block is partial; its out-of-bounds rows hold
        # unspecified VMEM data, so mask them (NaN-safe via where). Full blocks
        # take the cheap unmasked path. Masked-out rows contribute <= eps^2 each
        # (~1e-32), far below f32 resolution of the result.
        g_idx = split * num_s + s

        @pl.when(g_idx != num_blocks - 1)
        def _():
            accumulate(g_ref[...])

        @pl.when(g_idx == num_blocks - 1)
        def _():
            g = g_ref[...]
            row = jax.lax.broadcasted_iota(jnp.int32, g.shape, 1)
            accumulate(jnp.where(row < rem_rows, g, 0.0))

    @pl.when(s == num_s - 1)
    def _():
        o_ref[...] = acc_ref[...].reshape(o_ref.shape)


# -----------------------------------------------------------------------------
# Wrapper: tiling decisions + tiny finalize
# -----------------------------------------------------------------------------
def gradient_penalty_from_grad(grad_2d, *, eps=1e-16, constant=1.0):
    """grad_2d: [B, D] flattened per-sample gradient (any float dtype; accumulation
    is f32 in-kernel). Returns mean_b (||grad_b + eps||_2 - constant)^2."""
    B, D = grad_2d.shape
    itemsize = grad_2d.dtype.itemsize

    # Lane-dense [B, R, 128] view; pad D to a multiple of 128 only if needed
    # (zero padding perturbs each row's sum-of-squares by <= 127*eps^2 ~ 1e-29).
    d_pad = pl.cdiv(D, _LANE) * _LANE
    if d_pad != D:
        grad_2d = jnp.pad(grad_2d, ((0, 0), (0, d_pad - D)))
    R = d_pad // _LANE
    grad_3d = grad_2d.reshape(B, R, _LANE)

    # VMEM-budget-driven tile: ~4 MiB per input buffer (double buffered -> ~8 MiB).
    target_block_bytes = 4 * 1024 * 1024
    s_max = max(_SUBLANE,
                (target_block_bytes // (_LANE * itemsize)) // _SUBLANE * _SUBLANE)
    r_ceil = pl.cdiv(R, _SUBLANE) * _SUBLANE
    S = min(s_max, r_ceil)

    num_blocks = pl.cdiv(R, S)     # R-blocks per sample
    rem_rows = R % S               # valid rows of the (single) partial block, 0 if none
    # Split the reduction range in two when it divides evenly: gives v7x's two
    # TensorCores a parallel axis even when B == 1 (harmless on 1-TC chips).
    nsplit = 2 if (num_blocks >= 2 and num_blocks % 2 == 0) else 1
    num_s = num_blocks // nsplit

    kernel = functools.partial(_gp_partial_kernel, eps=eps, num_s=num_s,
                               num_blocks=num_blocks, rem_rows=rem_rows)

    out_bytes = nsplit * B * _SUBLANE * _LANE * 4
    cost = pl.CostEstimate(flops=3 * B * d_pad, transcendentals=0,
                           bytes_accessed=B * d_pad * itemsize + out_bytes)

    partials = pl.pallas_call(
        kernel,
        out_shape=jax.ShapeDtypeStruct((nsplit, B, _SUBLANE, _LANE), jnp.float32),
        grid_spec=pltpu.PrefetchScalarGridSpec(
            num_scalar_prefetch=0,
            grid=(nsplit, B, num_s),
            in_specs=[pl.BlockSpec(
                (1, S, _LANE),
                lambda split, b, s: (b, split * num_s + s, 0))],
            out_specs=pl.BlockSpec(
                (1, 1, _SUBLANE, _LANE),
                lambda split, b, s: (split, b, 0, 0)),
            scratch_shapes=[pltpu.VMEM((_SUBLANE, _LANE), jnp.float32)],
        ),
        compiler_params=pltpu.CompilerParams(
            dimension_semantics=("parallel", "parallel", "arbitrary"),
            vmem_limit_bytes=32 * 1024 * 1024,
        ),
        cost_estimate=cost,
    )(grad_3d)

    # Tiny finalize in plain XLA: combine per-core / per-lane partials.
    ssq = jnp.sum(partials, axis=(0, 2, 3))        # (B,) sum of squares
    norm = jnp.sqrt(ssq)                           # ||grad_b + eps||_2
    return jnp.mean((norm - constant) ** 2)


# -----------------------------------------------------------------------------
# Full forward: mirrors GradientPenaltyLoss.forward
# -----------------------------------------------------------------------------
def gradient_penalty_loss(critic_fn, interp, *, eps=1e-16, constant=1.0):
    """Equivalent of GradientPenaltyLoss()(interp, interp_crit) with
    interp_crit = critic_fn(interp)."""
    # TODO(synk): torch.autograd.grad has no Pallas equivalent; realised via jax.vjp.
    interp_crit, vjp_fn = jax.vjp(critic_fn, interp)
    grad_outputs = jnp.ones_like(interp_crit)      # get_grad_outputs(...)
    (grad_interp,) = vjp_fn(grad_outputs)
    grad_2d = grad_interp.reshape(grad_interp.shape[0], -1)
    return gradient_penalty_from_grad(grad_2d, eps=eps, constant=constant)


# -----------------------------------------------------------------------------
# Demo
# -----------------------------------------------------------------------------
if __name__ == "__main__":
    key = jax.random.PRNGKey(0)
    k_x, k_w = jax.random.split(key)

    # interp: NCHW, small shapes
    B, C, H, W = 2, 4, 16, 16
    interp = jax.random.normal(k_x, (B, C, H, W), dtype=jnp.float32)

    # Deterministic synthetic critic: flatten -> linear -> scalar per sample.
    D = C * H * W
    w_crit = jax.random.normal(k_w, (D, 1), dtype=jnp.float32) * 0.05

    def critic_fn(x):
        return jnp.tanh(x.reshape(x.shape[0], -1) @ w_crit)   # (B, 1)

    loss = gradient_penalty_loss(critic_fn, interp, eps=1e-16, constant=1.0)
    loss = jax.block_until_ready(loss)

    # Pure-JAX reference check of the penalty computation
    crit_out, vjp_fn = jax.vjp(critic_fn, interp)
    (g,) = vjp_fn(jnp.ones_like(crit_out))
    g2 = g.reshape(B, -1)
    ref = jnp.mean((jnp.linalg.norm(g2 + 1e-16, axis=1) - 1.0) ** 2)
    assert jnp.allclose(loss, ref, rtol=1e-5, atol=1e-6), (loss, ref)

    print("KERNEL_OK")
</pallas_src>

<mosaic_0001>
module attributes {stable_mosaic.version = 11 : i64} {
  func.func @_gp_partial_kernel(%arg0: i32, %arg1: i32, %arg2: i32, %arg3: memref<1x8x128xf32, #tpu.memory_space<vmem>>, %arg4: memref<1x1x8x128xf32, #tpu.memory_space<vmem>>, %arg5: memref<8x128xf32, #tpu.memory_space<vmem>>) attributes {dimension_semantics = [#tpu.dimension_semantics<parallel>, #tpu.dimension_semantics<parallel>, #tpu.dimension_semantics<arbitrary>], iteration_bounds = array<i64: 1, 2, 1>, scalar_prefetch = 0 : i64, scratch_operands = 1 : i64, tpu.core_type = #tpu.core_type<tc>, window_params = [{transform_indices = @transform_0, window_bounds = array<i64: 1, 8, 128>}, {transform_indices = @transform_1, window_bounds = array<i64: 1, 1, 8, 128>}]} {
    %c0_i32 = arith.constant 0 : i32
    %0 = arith.cmpi eq, %arg2, %c0_i32 : i32
    %1 = arith.extui %0 : i1 to i32
    %c0_i32_0 = arith.constant 0 : i32
    %2 = arith.cmpi ne, %1, %c0_i32_0 : i32
    scf.if %2 {
      %cst_10 = arith.constant 0.000000e+00 : f32
      %14 = vector.broadcast %cst_10 : f32 to vector<8x128xf32>
      %c0_11 = arith.constant 0 : index
      %c0_12 = arith.constant 0 : index
      %15 = vector.load %arg5[%c0_11, %c0_12] : memref<8x128xf32, #tpu.memory_space<vmem>>, vector<8x128xf32>
      tpu.vector_store %arg5[%c0_11, %c0_12], %14 {strides = array<i32>} : memref<8x128xf32, #tpu.memory_space<vmem>>, vector<8x128xf32>,
    } else {
    }
    %c0 = arith.constant 0 : index
    %c0_1 = arith.constant 0 : index
    %c0_2 = arith.constant 0 : index
    %3 = vector.load %arg3[%c0, %c0_1, %c0_2] : memref<1x8x128xf32, #tpu.memory_space<vmem>>, vector<1x8x128xf32>
    %cst = arith.constant 1.000000e-16 : f32
    %4 = vector.broadcast %cst : f32 to vector<1x8x128xf32>
    %5 = arith.addf %3, %4 : vector<1x8x128xf32>
    %6 = arith.mulf %5, %5 : vector<1x8x128xf32>
    %c0_3 = arith.constant 0 : index
    %c0_4 = arith.constant 0 : index
    %7 = vector.load %arg5[%c0_3, %c0_4] : memref<8x128xf32, #tpu.memory_space<vmem>>, vector<8x128xf32>
    %cst_5 = arith.constant dense<0.000000e+00> : vector<8x128xf32>
    %8 = vector.multi_reduction <add>, %6, %cst_5 [0] : vector<1x8x128xf32> to vector<8x128xf32>
    %9 = arith.addf %7, %8 : vector<8x128xf32>
    %c0_6 = arith.constant 0 : index
    %c0_7 = arith.constant 0 : index
    %10 = vector.load %arg5[%c0_6, %c0_7] : memref<8x128xf32, #tpu.memory_space<vmem>>, vector<8x128xf32>
    tpu.vector_store %arg5[%c0_6, %c0_7], %9 {strides = array<i32>} : memref<8x128xf32, #tpu.memory_space<vmem>>, vector<8x128xf32>,
    %c0_i32_8 = arith.constant 0 : i32
    %11 = arith.cmpi eq, %arg2, %c0_i32_8 : i32
    %12 = arith.extui %11 : i1 to i32
    %c0_i32_9 = arith.constant 0 : i32
    %13 = arith.cmpi ne, %12, %c0_i32_9 : i32
    scf.if %13 {
      %c0_10 = arith.constant 0 : index
      %c0_11 = arith.constant 0 : index
      %14 = vector.load %arg5[%c0_10, %c0_11] : memref<8x128xf32, #tpu.memory_space<vmem>>, vector<8x128xf32>
      %15 = vector.shape_cast %14 : vector<8x128xf32> to vector<1x1x8x128xf32>
      %c0_12 = arith.constant 0 : index
      %c0_13 = arith.constant 0 : index
      %c0_14 = arith.constant 0 : index
      %c0_15 = arith.constant 0 : index
      %16 = vector.load %arg4[%c0_12, %c0_13, %c0_14, %c0_15] : memref<1x1x8x128xf32, #tpu.memory_space<vmem>>, vector<1x1x8x128xf32>
      tpu.vector_store %arg4[%c0_12, %c0_13, %c0_14, %c0_15], %15 {strides = array<i32>} : memref<1x1x8x128xf32, #tpu.memory_space<vmem>>, vector<1x1x8x128xf32>,
    } else {
    }
    return
  }
  func.func @transform_0(%arg0: i32, %arg1: i32, %arg2: i32) -> (i32, i32, i32) {
    %c1_i32 = arith.constant 1 : i32
    %0 = arith.muli %arg0, %c1_i32 : i32
    %1 = arith.addi %0, %arg2 : i32
    %c0_i32 = arith.constant 0 : i32
    %c0_i32_0 = arith.constant 0 : i32
    return %arg1, %1, %c0_i32 : i32, i32, i32
  }
  func.func @transform_1(%arg0: i32, %arg1: i32, %arg2: i32) -> (i32, i32, i32, i32) {
    %c0_i32 = arith.constant 0 : i32
    %c0_i32_0 = arith.constant 0 : i32
    %c0_i32_1 = arith.constant 0 : i32
    return %arg0, %arg1, %c0_i32, %c0_i32_0 : i32, i32, i32, i32
  }
}

</mosaic_0001>

<bundles_post_ra>
// kernel: tpu_custom_call.1
= control target key start
LH: loop header
LB: loop body
LE: loop exit
PB: predicated region body
PF: predicated region fallthrough
CT: control target
= control target key end

     0   :  { %6 = vsyncpa [#allocation4], 0  ;;  %s651_s0 = inlined_call_operand.hbm [shape: f32[2,8,128], index: 0, kind: input, shape index: {}]   ;;  %s652_s1 = inlined_call_operand.hbm [shape: f32[1,2,8,128], index: 1, kind: output, shape index: {}]  }
   0x1   :  { %8 = vsyncpa [#allocation4 + $0x1], 0 }
   0x2   :  { %9 = vsyncpa [#allocation5], 0 }
   0x3   :  { %11 = vsyncpa [#allocation5 + $0x1], 0  ;;  %s479_s6 = smov 0   ;;  %s481_s7 = smov 0  }
   0x4   :  { %s483_s8 = smov 0   ;;  %s485_s9 = smov 0  }
   0x5   :  { %s487_s10 = smov 0   ;;  %s489_s11 = smov 0  }
   0x6 LB: > { %s278_s12 = sadd.s32 4294967295, %s465_s11   ;;  %s279_s13 = sadd.s32 4294967294, %s465_s11   ;;  %s465_s11 = sphi %s489_s11, %s17_s11   ;;  %s461_s10 = sphi %s487_s10, %s668_s10   ;;  %s457_s9 = sphi %s485_s9, %s667_s9   ;;  %s453_s8 = sphi %s483_s8, %s666_s8   ;;  %s449_s7 = sphi %s481_s7, %s665_s7   ;;  %s445_s6 = sphi %s479_s6, %s664_s6  }
   0x7   : > { %s32_s14 = sadd.s32 1, %s461_s10  ;;  %s47_s15 = sadd.s32 1, %s453_s8 }
   0x8   : > { %p34_p0 = scmp.ge.s32.totalorder %s32_s14, 2  ;;  %p54_p1 = scmp.ne.s32.totalorder %s453_s8, %s449_s7 }
   0x9   : > { %p55_p2 = scmp.eq.s32.totalorder %s465_s11, 0  ;;  %p60_p3 = scmp.ne.s32.totalorder %s449_s7, %s445_s6 }
   0xa   : > { %s670_s14 = smov (%p34_p0, %s32_s14), 0  ;;  %p61_p5 = scmp.eq.s32.totalorder %s278_s12, 0 }
   0xb   : > { %p520_p4 = por %p55_p2, %p54_p1  ;;  %s42_s17 = ssub.s32 %s461_s10, %s670_s14 }
   0xc   : > { %p86_p6 = scmp.eq.s32.totalorder %s278_s12, 1  ;;  %p45_p7 = scmp.eq.s32.totalorder %s42_s17, 0 }
   0xd   : > { %p526_p8 = por %p61_p5, %p60_p3  ;;  %p92_p10 = scmp.eq.s32.totalorder %s279_s13, 1 }
   0xe   : > { %p530_p9 = por %p86_p6, %p54_p1  ;;  %p303_p13 = scmp.lt.s32.totalorder %s465_s11, 2 }
   0xf   : > { %s535_s20 = scalar_select %p45_p7, %s453_s8, %s47_s15  }
  0x10   : > { %s656_s19 = scalar_select %p530_p9, 1, 0 }
  0x11   : > { %p537_p11 = por %p92_p10, %p60_p3  ;;  %s112_s22 = sand.u32 1, %s453_s8  }
  0x12   : > { %s282_s23 = sshll.u32 %s112_s22, 3  ;;  %s283_s24 = sshll.u32 %s461_s10, 7 }
  0x13   : > { %s657_s21 = scalar_select %p537_p11, 1, 0 }
  0x14   : > { %s548_s27 = scalar_lea.hbm %s651_s0, %s283_s24  ;;  %s116_s28 = scalar_lea.vmem [#allocation3], %s282_s23 }
  0x15   : > { %s125_s29 = sshll.u32 %s116_s28, 4  ;;  %p554_p0 = pnand %p303_p13, %p520_p4  ;;  %s550_s29 = int_to_ptr.vmem [resolvable:$true] %s125_s29 }
  0x16   : > { %s113_s2 = scalar_lea.sflag [#allocation4], %s112_s22  ;;  %s353_s3 = scalar_lea.hbm %s548_s27, 128 }
  0x17   : > { %p354_p3 = scmp.ne.s32.totalorder %s548_s27, %s353_s3  ;;  %p355_p5 = pneg %p554_p0 }
  0x18   : > { %s358_s12 = scalar_lea.hbm %s651_s0, 256  ;;  %p359_p4 = scmp.lt.u32.totalorder %s548_s27, %s651_s0 }
  0x19   : > { %p356_p6 = pnand %p355_p5, %p354_p3  ;;  %p360_p10 = scmp.lt.u32.totalorder %s358_s12, %s353_s3 }
  0x1a   : > { %p362_p12 = scmp.lt.u32.totalorder %s353_s3, %s548_s27 }
  0x1b   : > { %p357_p7 = pneg %p356_p6  ;;  %p361_p13 = por %p360_p10, %p359_p4 }
  0x1d   : > { %p363_p1 = por %p362_p12, %p361_p13 }
  0x1f   : > { %p364_p2 = pnand %p363_p1, %p357_p7 }
  0x21   : > { %367 = shalt.err (!%p364_p2)
}
  0x22   : > { %s368_s16 = scalar_lea.vmem %s550_s29, 128  ;;  %s467_s17 = smov [#allocation3]  }
  0x23   : > { %p369_p3 = scmp.ne.s32.totalorder %s550_s29, %s368_s16  ;;  %s373_s22 = sshll.u32 %s467_s17, 4  ;;  %s374_s22 = int_to_ptr.vmem [resolvable:$false] %s373_s22 }
  0x24   : > { %s375_s23 = scalar_lea.vmem %s374_s22, 256  ;;  %p376_p9 = scmp.lt.s32.totalorder %s550_s29, %s374_s22 }
  0x25   : > { %p371_p6 = pnand %p369_p3, %p355_p5  ;;  %p377_p4 = scmp.lt.s32.totalorder %s375_s23, %s368_s16 }
  0x27   : > { %p372_p11 = pneg %p371_p6  ;;  %p378_p10 = por %p377_p4, %p376_p9 }
  0x29   : > { %p379_p12 = pnand %p378_p10, %p372_p11 }
  0x2b   : > { %382 = shalt.err (!%p379_p12)
}
  0x2c   : > { %298 = dma.hbm_to_vmem [thread:$0]  (!%p554_p0), %s548_s27, 128, %s550_s29, %s113_s2  }
  0x2d   : > { %p659_p1 = scmp.lt.s32.totalorder %s465_s11, 3  ;;  %p660_p2 = scmp.ge.s32.totalorder %s465_s11, 1 }
  0x2f   : > { %p131_p5 = pnand %p660_p2, %p659_p1 }
  0x30   : > { %s590_s24 = sand.u32 (!%p131_p5), 1, %s449_s7  }
  0x31   : > { %134 = sbr.rel (%p131_p5) target bundleno = 83 (0x53), region = 24  ;;  %s285_s25 = sshll.u32 (!%p131_p5), %s590_s24, 3 }
  0x32   : > { %s137_s26 = scalar_lea.sflag (!%p131_p5), [#allocation4], %s590_s24  ;;  %s140_s28 = scalar_lea.vmem (!%p131_p5), [#allocation3], %s285_s25 }
  0x38   : > { %436 = dma.done.wait (%p526_p8), %s137_s26, 128  }
  0x39   : > { %438 = vsyncadd (%p526_p8), %s137_s26, 4294967168  ;;  %v165_v0 = vld [vmem:[%s140_s28] sm:$0xff]  ;;  %s158_s27 = scalar_lea.vmem [#allocation6], %s285_s25  ;;  %s288_s30 = sshll.u32 %s457_s9, 7 }
  0x3a   : > { %s193_s29 = sshll.u32 %s158_s27, 4  ;;  %v166_v1 = vadd.f32 1e-16, %v165_v0  ;;  %s604_s4 = scalar_lea.hbm %s652_s1, %s288_s30  ;;  %s599_s29 = int_to_ptr.vmem [resolvable:$true] %s193_s29 }
  0x3b   : > { %s178_s18 = scalar_lea.sflag [#allocation5], %s590_s24  ;;  %s383_s5 = scalar_lea.vmem %s599_s29, 128 }
  0x3c   : > { %v167_v2 = vmul.f32 %v166_v1, %v166_v1  ;;  %p384_p8 = scmp.ne.s32.totalorder %s599_s29, %s383_s5  ;;  %p661_p9 = scmp.ne.s32.totalorder %s656_s19, 0 }
  0x3d   : > { %s468_s9 = smov [#allocation6]  }
  0x3e   : > { %176 = vst [vmem:[%s158_s27] sm:$0xff] %v167_v2  ;;  %p385_p11 = pnand %p384_p8, %p661_p9  ;;  %s387_s12 = sshll.u32 %s468_s9, 4  ;;  %s388_s12 = int_to_ptr.vmem [resolvable:$false] %s387_s12 }
  0x3f   : > { %s389_s13 = scalar_lea.vmem %s388_s12, 256  ;;  %p390_p7 = scmp.lt.s32.totalorder %s599_s29, %s388_s12 }
  0x40   : > { %p386_p0 = pneg %p385_p11  ;;  %p391_p13 = scmp.lt.s32.totalorder %s389_s13, %s383_s5 }
  0x42   : > { %p392_p3 = por %p391_p13, %p390_p7 }
  0x44   : > { %p393_p6 = pnand %p392_p3, %p386_p0 }
  0x46   : > { %396 = shalt.err (!%p393_p6)
}
  0x47   : > { %s397_s15 = scalar_lea.hbm %s604_s4, 128  ;;  %s401_s22 = scalar_lea.hbm %s652_s1, 256 }
  0x48   : > { %p398_p4 = scmp.ne.s32.totalorder %s604_s4, %s397_s15  ;;  %p402_p1 = scmp.lt.u32.totalorder %s604_s4, %s652_s1 }
  0x49   : > { %p403_p2 = scmp.lt.u32.totalorder %s401_s22, %s397_s15  ;;  %p405_p8 = scmp.lt.u32.totalorder %s397_s15, %s604_s4 }
  0x4a   : > { %p399_p10 = pnand %p398_p4, %p661_p9 }
  0x4b   : > { %p404_p5 = por %p403_p2, %p402_p1 }
  0x4c   : > { %p400_p12 = pneg %p399_p10 }
  0x4d   : > { %p406_p11 = por %p405_p8, %p404_p5 }
  0x4f   : > { %p407_p0 = pnand %p406_p11, %p400_p12 }
  0x51   : > { %410 = shalt.err (!%p407_p0)
}
  0x52   : > { %293 = dma.vmem_to_hbm [thread:$0]  (%p661_p9), %s599_s29, 128, %s604_s4, %s178_s18  }
  0x53 PF: > { %s205_s25 = sand.u32 1, %s445_s6   ;;  %p662_p7 = scmp.ne.s32.totalorder %s657_s21, 0 }
  0x54   : > { %p663_p13 = scmp.ge.s32.totalorder %s465_s11, 2  ;;  %s206_s26 = scalar_lea.sflag [#allocation5], %s205_s25 }
  0x56   : > { %p300_p3 = pnand %p663_p13, %p662_p7 }
  0x58   : > { %440 = dma.done.wait (!%p300_p3), %s206_s26, 128  }
  0x59   : > { %442 = vsyncadd (!%p300_p3), %s206_s26, 4294967168  ;;  %s17_s11 = sadd.s32 1, %s465_s11   ;;  %s664_s6 = smov %s449_s7 }
  0x5a   : > { %p14_p6 = scmp.ge.s32.totalorder %s17_s11, 4   ;;  %s665_s7 = smov %s453_s8 }
  0x5b   : > { %s666_s8 = smov %s535_s20  ;;  %s667_s9 = smov %s461_s10 }
  0x5c   : > { %s668_s10 = smov %s670_s14  ;;  %16 = sbr.rel (!%p14_p6) target bundleno = 6 (0x6), region = 77 }
  0x63   :  { %211 = vsyncpa [#allocation4], 1 }
  0x64   :  { %213 = vsyncpa [#allocation4 + $0x1], 1 }
  0x65   :  { %214 = vsyncpa [#allocation5], 1 }
  0x66   :  { %216 = vsyncpa [#allocation5 + $0x1], 1 }

</bundles_post_ra>
